<compile_context>
chip_gen: v6e
topology: v6e:2x2x1
jax: 0.10.0
libtpu: 0.0.40
codegen_flags: <defaults>
</compile_context>

<pallas_src>
import functools

import jax
import jax.numpy as jnp
from jax import lax
from jax.experimental import pallas as pl
from jax.experimental.pallas import tpu as pltpu


_TARGET_F_BLOCK_BYTES = 4 << 20   # ~4 MiB per F input tile (review guidance)


def _cdiv(a, b):
    return (a + b - 1) // b


def _round_up(x, m):
    return _cdiv(x, m) * m


def _vmem_budget_bytes():
    """3/4 of this generation's VMEM (96 MiB v5e/v6e, 48 MiB v7x)."""
    cap = 64 << 20                           # conservative fallback (v7x)
    try:
        cap = int(pltpu.get_tpu_info().vmem_capacity_bytes)
    except Exception:
        pass
    cap = min(max(cap, 32 << 20), 128 << 20)
    return (cap * 3) // 4


def _choose_tk(nc_p, hw, itemsize, vmem_budget, gram_scratch_bytes):
    """Pick the K (H*W) tile: big enough to amortize per-step overhead,
    small enough to fit VMEM, preferring an exact divisor of hw."""
    # VMEM headroom left for the double-buffered F tile.
    avail = vmem_budget - gram_scratch_bytes - (2 << 20)
    per_col = 2 * nc_p * itemsize                    # double-buffered column
    tk_vmem = max(128, avail // per_col)
    # ~4 MiB per F block.
    tk_size = max(512, _TARGET_F_BLOCK_BYTES // (nc_p * itemsize))
    # keep >= ~4 grid steps so the DMA pipeline still overlaps compute.
    tk_pipe = max(512, _cdiv(hw, 4))
    tk = min(tk_vmem, tk_size, tk_pipe, _round_up(hw, 128))
    tk = max(128, (tk // 128) * 128)
    if hw % 128 == 0:
        # Choose a 128-multiple that divides hw exactly -> no column pad.
        m = hw // 128
        best = 1
        for d in range(1, min(m, tk // 128) + 1):
            if m % d == 0:
                best = d
        tk = 128 * best
    return tk


def _prep_features(x):
    """NCHW -> 2-D feature matrix F (rows = N*C, cols = H*W), padded only
    when unavoidable.  Returns layout/tile metadata used by both kernels."""
    n, c, h, w = x.shape
    nc, hw = n * c, h * w
    itemsize = jnp.dtype(x.dtype).itemsize
    sub = max(8, 32 // itemsize)                     # dtype sublane tile
    nc_p = _round_up(nc, sub)
    gram_scratch = 2 * nc_p * nc_p * 4               # acc + target (or 2x out)
    budget = _vmem_budget_bytes()
    tk = _choose_tk(nc_p, hw, itemsize, budget, gram_scratch)
    hw_p = hw if hw % tk == 0 else _round_up(hw, tk)
    f = x.reshape(nc, hw)
    if (nc_p, hw_p) != (nc, hw):
        # Fallback only: zeros do not change F @ F^T, and padded gram entries
        # cancel in the MSE.  Common conv shapes skip this copy entirely.
        f = jnp.pad(f, ((0, nc_p - nc), (0, hw_p - hw)))
    # bf16 MXU feed only when compute-bound enough to matter (v5e especially).
    cast_bf16 = bool(x.dtype == jnp.float32 and nc >= 256)
    return f, nc, nc_p, hw, hw_p, tk, budget, cast_bf16


# ---------------------------------------------------------------------------
# Gram-matrix kernel:  G = (F @ F.T) * scale, reduced over the K (= H*W) axis.
# Output block is resident across k (constant index map) -> accumulate in it.
# ---------------------------------------------------------------------------
def _gram_kernel(f_ref, g_ref, *, scale, cast_bf16):
    k = pl.program_id(0)

    @pl.when(k == 0)
    def _():
        g_ref[...] = jnp.zeros_like(g_ref)

    f = f_ref[...]
    if cast_bf16:
        f = f.astype(jnp.bfloat16)       # VPU cast; accumulation stays f32
    # Contract the last axis of both operands -> no explicit transpose op.
    g_ref[...] += lax.dot_general(
        f, f, dimension_numbers=(((1,), (1,)), ((), ())),
        preferred_element_type=jnp.float32)

    @pl.when(k == pl.num_programs(0) - 1)
    def _():
        g_ref[...] = g_ref[...] * scale


def _gram_padded(x):
    """x: (N, C, H, W) -> padded gram (NC_pad, NC_pad) float32."""
    f, nc, nc_p, hw, hw_p, tk, budget, cast_bf16 = _prep_features(x)
    scale = 1.0 / float(nc * hw)
    return pl.pallas_call(
        functools.partial(_gram_kernel, scale=scale, cast_bf16=cast_bf16),
        out_shape=jax.ShapeDtypeStruct((nc_p, nc_p), jnp.float32),
        grid_spec=pltpu.PrefetchScalarGridSpec(
            num_scalar_prefetch=0,
            grid=(hw_p // tk,),
            in_specs=[pl.BlockSpec((nc_p, tk), lambda k: (0, k))],
            out_specs=pl.BlockSpec((nc_p, nc_p), lambda k: (0, 0)),
        ),
        compiler_params=pltpu.CompilerParams(
            dimension_semantics=("arbitrary",),
            vmem_limit_bytes=int(budget)),
    )(f)


def gram_matrix(x):
    """x: (N, C, H, W) -> gram (N*C, N*C) float32 (PyTorch-equivalent)."""
    n, c, _, _ = x.shape
    nc = n * c
    return _gram_padded(x)[:nc, :nc]


# ---------------------------------------------------------------------------
# Fused kernel: accumulate gram of x over K tiles; the target gram is DMA'd
# from HBM into a single VMEM buffer (started at step 0, waited at the last
# step, so it is hidden behind the reduction and never double-buffered).
# On the last step: mean((G*scale - T)^2) -> scalar in SMEM.
# ---------------------------------------------------------------------------
def _gram_mse_kernel(f_ref, t_hbm, loss_ref, acc_ref, tgt_ref, t_sem, *,
                     scale, inv_denom, cast_bf16):
    k = pl.program_id(0)

    @pl.when(k == 0)
    def _():
        acc_ref[...] = jnp.zeros_like(acc_ref)
        pltpu.make_async_copy(t_hbm, tgt_ref, t_sem).start()

    f = f_ref[...]
    if cast_bf16:
        f = f.astype(jnp.bfloat16)
    acc_ref[...] += lax.dot_general(
        f, f, dimension_numbers=(((1,), (1,)), ((), ())),
        preferred_element_type=jnp.float32)

    @pl.when(k == pl.num_programs(0) - 1)
    def _():
        pltpu.make_async_copy(t_hbm, tgt_ref, t_sem).wait()
        d = acc_ref[...] * scale - tgt_ref[...]
        # padded rows/cols are zero in both grams -> contribute 0; divide by
        # the ORIGINAL nc*nc so the loss scale matches PyTorch's mse_loss.
        loss_ref[0, 0] = jnp.sum(d * d) * inv_denom


def style_loss(x, target_gram):
    """x: (N, C, H, W); target_gram: (N*C, N*C) f32 -> scalar MSE loss."""
    f, nc, nc_p, hw, hw_p, tk, budget, cast_bf16 = _prep_features(x)
    assert target_gram.shape == (nc, nc), "target/input N*C mismatch"
    t = target_gram.astype(jnp.float32)
    if nc_p != nc:
        t = jnp.pad(t, ((0, nc_p - nc), (0, nc_p - nc)))
    scale = 1.0 / float(nc * hw)
    inv_denom = 1.0 / float(nc * nc)
    loss = pl.pallas_call(
        functools.partial(_gram_mse_kernel, scale=scale, inv_denom=inv_denom,
                          cast_bf16=cast_bf16),
        out_shape=jax.ShapeDtypeStruct((1, 1), jnp.float32),
        grid_spec=pltpu.PrefetchScalarGridSpec(
            num_scalar_prefetch=0,
            grid=(hw_p // tk,),
            in_specs=[pl.BlockSpec((nc_p, tk), lambda k: (0, k)),
                      pl.BlockSpec(memory_space=pl.ANY)],   # target stays in HBM
            out_specs=pl.BlockSpec(memory_space=pltpu.MemorySpace.SMEM),
            scratch_shapes=[pltpu.VMEM((nc_p, nc_p), jnp.float32),  # gram acc
                            pltpu.VMEM((nc_p, nc_p), jnp.float32),  # target buf
                            pltpu.SemaphoreType.DMA],
        ),
        compiler_params=pltpu.CompilerParams(
            dimension_semantics=("arbitrary",),
            vmem_limit_bytes=int(budget)),
    )(f, t)
    return loss[0, 0]


# ---------------------------------------------------------------------------
# Module equivalent
# ---------------------------------------------------------------------------
class StyleLossGramMatrix:
    """JAX/Pallas port of the PyTorch StyleLossGramMatrix module."""

    def __init__(self, target_feature):
        # target gram is "detached" -> just a constant array here.
        self.target = gram_matrix(target_feature)
        self.loss = jnp.float32(0.0)

    def __call__(self, x):
        self.loss = style_loss(x, self.target)
        return x  # forward returns its input unchanged


# ---------------------------------------------------------------------------
if __name__ == "__main__":
    key = jax.random.PRNGKey(0)
    k_tgt, k_in = jax.random.split(key)

    # small shapes consistent with NCHW conv features
    N, C, H, W = 2, 4, 16, 16
    target_feature = jax.random.normal(k_tgt, (N, C, H, W), dtype=jnp.float32)
    x = jax.random.normal(k_in, (N, C, H, W), dtype=jnp.float32)

    module = StyleLossGramMatrix(target_feature)
    out = module(x)
    jax.block_until_ready((out, module.loss))

    # lightweight correctness check against plain-JAX reference
    def ref_gram(a):
        n, c, h, w = a.shape
        f = a.reshape(n * c, h * w)
        return (f @ f.T) / (n * c * h * w)

    ref_loss = jnp.mean((ref_gram(x) - ref_gram(target_feature)) ** 2)
    assert jnp.allclose(out, x)
    assert jnp.allclose(module.target, ref_gram(target_feature),
                        rtol=1e-4, atol=1e-6)
    assert jnp.allclose(module.loss, ref_loss, rtol=1e-4, atol=1e-6)

    print("KERNEL_OK")
</pallas_src>

<mosaic_0001>
module attributes {stable_mosaic.version = 11 : i64} {
  func.func @_gram_kernel(%arg0: i32, %arg1: memref<8x256xf32, #tpu.memory_space<vmem>>, %arg2: memref<8x8xf32, #tpu.memory_space<vmem>>) attributes {dimension_semantics = [#tpu.dimension_semantics<arbitrary>], iteration_bounds = array<i64: 1>, scalar_prefetch = 0 : i64, scratch_operands = 0 : i64, tpu.core_type = #tpu.core_type<tc>, window_params = [{transform_indices = @transform_0, window_bounds = array<i64: 8, 256>}, {pipeline_mode = #tpu.pipeline_mode<synchronous>, transform_indices = @transform_1, window_bounds = array<i64: 8, 8>}]} {
    %c0_i32 = arith.constant 0 : i32
    %0 = arith.cmpi eq, %arg0, %c0_i32 : i32
    %1 = arith.extui %0 : i1 to i32
    %c0_i32_0 = arith.constant 0 : i32
    %2 = arith.cmpi ne, %1, %c0_i32_0 : i32
    scf.if %2 {
      %cst_8 = arith.constant 0.000000e+00 : f32
      %11 = vector.broadcast %cst_8 : f32 to vector<8x8xf32>
      %c0_9 = arith.constant 0 : index
      %c0_10 = arith.constant 0 : index
      %12 = vector.load %arg2[%c0_9, %c0_10] : memref<8x8xf32, #tpu.memory_space<vmem>>, vector<8x8xf32>
      tpu.vector_store %arg2[%c0_9, %c0_10], %11 {strides = array<i32>} : memref<8x8xf32, #tpu.memory_space<vmem>>, vector<8x8xf32>,
    } else {
    }
    %c0 = arith.constant 0 : index
    %c0_1 = arith.constant 0 : index
    %3 = vector.load %arg1[%c0, %c0_1] : memref<8x256xf32, #tpu.memory_space<vmem>>, vector<8x256xf32>
    %c0_2 = arith.constant 0 : index
    %c0_3 = arith.constant 0 : index
    %4 = vector.load %arg2[%c0_2, %c0_3] : memref<8x8xf32, #tpu.memory_space<vmem>>, vector<8x8xf32>
    %cst = arith.constant dense<0.000000e+00> : vector<8x8xf32>
    %5 = tpu.matmul %3, %3, %cst {dimension_numbers = #tpu.dot_dimension_numbers<[1], [1], [0], [0], [0, 0, 1, 0], [], []>} : vector<8x256xf32>, vector<8x256xf32>, vector<8x8xf32> -> vector<8x8xf32>
    %6 = arith.addf %4, %5 : vector<8x8xf32>
    %c0_4 = arith.constant 0 : index
    %c0_5 = arith.constant 0 : index
    %7 = vector.load %arg2[%c0_4, %c0_5] : memref<8x8xf32, #tpu.memory_space<vmem>>, vector<8x8xf32>
    tpu.vector_store %arg2[%c0_4, %c0_5], %6 {strides = array<i32>} : memref<8x8xf32, #tpu.memory_space<vmem>>, vector<8x8xf32>,
    %c0_i32_6 = arith.constant 0 : i32
    %8 = arith.cmpi eq, %arg0, %c0_i32_6 : i32
    %9 = arith.extui %8 : i1 to i32
    %c0_i32_7 = arith.constant 0 : i32
    %10 = arith.cmpi ne, %9, %c0_i32_7 : i32
    scf.if %10 {
      %c0_8 = arith.constant 0 : index
      %c0_9 = arith.constant 0 : index
      %11 = vector.load %arg2[%c0_8, %c0_9] : memref<8x8xf32, #tpu.memory_space<vmem>>, vector<8x8xf32>
      %cst_10 = arith.constant 4.8828125E-4 : f32
      %12 = vector.broadcast %cst_10 : f32 to vector<8x8xf32>
      %13 = arith.mulf %11, %12 : vector<8x8xf32>
      %c0_11 = arith.constant 0 : index
      %c0_12 = arith.constant 0 : index
      %14 = vector.load %arg2[%c0_11, %c0_12] : memref<8x8xf32, #tpu.memory_space<vmem>>, vector<8x8xf32>
      tpu.vector_store %arg2[%c0_11, %c0_12], %13 {strides = array<i32>} : memref<8x8xf32, #tpu.memory_space<vmem>>, vector<8x8xf32>,
    } else {
    }
    return
  }
  func.func @transform_0(%arg0: i32) -> (i32, i32) {
    %c0_i32 = arith.constant 0 : i32
    %c0_i32_0 = arith.constant 0 : i32
    return %c0_i32, %arg0 : i32, i32
  }
  func.func @transform_1(%arg0: i32) -> (i32, i32) {
    %c0_i32 = arith.constant 0 : i32
    %c0_i32_0 = arith.constant 0 : i32
    %c0_i32_1 = arith.constant 0 : i32
    return %c0_i32, %c0_i32_0 : i32, i32
  }
}

</mosaic_0001>

<bundles_post_ra>
// kernel: tpu_custom_call.1
= control target key start
LH: loop header
LB: loop body
LE: loop exit
PB: predicated region body
PF: predicated region fallthrough
CT: control target
= control target key end

     0   :  { %6 = vsyncpa [#allocation3], 0  ;;  %s193_s0 = inlined_call_operand.hbm [shape: f32[8,256], index: 0, kind: input, shape index: {}]   ;;  %s194_s1 = inlined_call_operand.hbm [shape: f32[8,8], index: 1, kind: output, shape index: {}]  }
   0x1   :  { %7 = vsyncpa [#allocation4], 0  ;;  %s171_s6 = smov [#allocation2]  }
   0x2   :  { %s14_s7 = sshll.u32 %s171_s6, 4  ;;  %s15_s7 = int_to_ptr.vmem [resolvable:$true] %s14_s7 }
   0x3   :  { %s135_s8 = scalar_lea.vmem %s15_s7, 256  ;;  %p140_p1 = scmp.lt.s32.totalorder %s15_s7, %s15_s7 }
   0x4   :  { %p136_p0 = scmp.ne.s32.totalorder %s15_s7, %s135_s8  ;;  %p141_p2 = scmp.lt.s32.totalorder %s135_s8, %s135_s8 }
   0x6   :  { %p142_p3 = por %p141_p2, %p140_p1 }
   0x8   :  { %p143_p4 = pnand %p142_p3, %p136_p0 }
   0xa   :  { %146 = shalt.err (!%p143_p4)
}
   0xb   :  { %17 = dma.hbm_to_vmem [thread:$0]  %s193_s0, 256, %s15_s7, [#allocation3]  }
   0xc   :  { %167 = dma.done.wait [#allocation3], 256  }
   0xd   :  { %168 = vsyncadd [#allocation3], 4294967040  ;;  %vm25_vm0 = vcmask 64512   ;;  %v172_v0 = vmov 0.0   ;;  %v28_v1 = vld [vmem:[#allocation2 + $0x8] sm:$0xff]  ;;  %v27_v2 = vld [vmem:[#allocation2] sm:$0xff] }
   0xe   :  { %26 = vst.msk [vmem:[#allocation5] sm:$0xff] %vm25_vm0, %v172_v0  ;;  %60 = vmatprep.subr.mxu0 %v28_v1  ;;  %94 = vmatprep.mubr.f32.mxu0 %v28_v1  ;;  %s173_s11 = smov [#allocation5]  }
   0xf   :  { %61 = vmatpush1.xpose.msra.mxu0 %v27_v2  ;;  %s115_s0 = sshll.u32 %s173_s11, 4  ;;  %s116_s0 = int_to_ptr.vmem [resolvable:$true] %s115_s0 }
  0x10   :  { %s147_s12 = scalar_lea.vmem %s116_s0, 128  ;;  %p152_p6 = scmp.lt.s32.totalorder %s116_s0, %s116_s0 }
  0x11   :  { %p148_p5 = scmp.ne.s32.totalorder %s116_s0, %s147_s12  ;;  %p153_p7 = scmp.lt.s32.totalorder %s147_s12, %s147_s12 }
  0x12   :  { %95 = vmatmul.mubr.f32.vlgmr.msra.gmra.mxu0 %v27_v2 }
  0x13   :  { %p154_p8 = por %p153_p7, %p152_p6 }
  0x15   :  { %v29_v3 = vld [vmem:[#allocation5] sm:$0xff]  ;;  %p155_p9 = pnand %p154_p8, %p148_p5 }
  0xd2   :  { %v96_v4 = vpop.f32.mrf.mxu0 }
  0xd3   :  { %v100_v5 = vadd.f32 %v96_v4, %v29_v3 }
  0xd4   :  { %v98_v6 = vpop.f32.mrf.mxu0 }
  0xd5   :  { %102 = vst.msk [vmem:[#allocation5] sm:$0xff] %vm25_vm0, %v100_v5 }
  0xdc   :  { %v106_v7 = vld [vmem:[#allocation5] sm:$0xff] }
  0xdd   :  { %v107_v8 = vmul.f32 0.00048828125, %v106_v7 }
  0xdf   :  { %108 = vst.msk [vmem:[#allocation5] sm:$0xff] %vm25_vm0, %v107_v8 }
  0xe0   :  { %158 = shalt.err (!%p155_p9)
}
  0xe1   :  { %118 = dma.vmem_to_hbm [thread:$0]  %s116_s0, 128, %s194_s1, [#allocation4]  }
  0xe2   :  { %169 = dma.done.wait [#allocation4], 128  }
  0xe3   :  { %170 = vsyncadd [#allocation4], 4294967168 }
  0xe4   :  { %122 = vsyncpa [#allocation3], 1 }
  0xe5   :  { %123 = vsyncpa [#allocation4], 1 }

</bundles_post_ra>
